<compile_context>
chip_gen: v6e
topology: v6e:2x2x1
jax: 0.10.0
libtpu: 0.0.40
codegen_flags: <defaults>
</compile_context>

<pallas_src>
import jax
import jax.numpy as jnp
from jax import lax
from jax.experimental import pallas as pl
from jax.experimental.pallas import tpu as pltpu


def _late_fusion_fc_kernel(x_ref, w_ref, b_ref, o_ref, acc_ref):
    """One (row-tile, k-tile) step of y = x @ W.T + b.

    x_ref:   (tile_m, tile_k)  input rows
    w_ref:   (n_pad, tile_k)   PyTorch-layout weight slab (lane-dense N)
    b_ref:   (1, n_pad)        f32 bias
    o_ref:   (tile_m, n_pad)   output rows
    acc_ref: (tile_m, n_pad)   f32 accumulator scratch (persists across k)
    """
    k = pl.program_id(1)

    @pl.when(k == 0)
    def _init():
        acc_ref[...] = jnp.zeros_like(acc_ref)

    # [M, K] x [N, K] contraction on the MXU: both operands contract on their
    # lane axis, so no transpose of the weight is ever materialized.
    acc_ref[...] += lax.dot_general(
        x_ref[...], w_ref[...],
        dimension_numbers=(((1,), (1,)), ((), ())),
        preferred_element_type=jnp.float32,
    )

    @pl.when(k == pl.num_programs(1) - 1)
    def _finalize():
        # Bias add + cast stay in f32 (v5e VPU has no bf16 path).
        o_ref[...] = (acc_ref[...] + b_ref[...]).astype(o_ref.dtype)


def late_fusion_fc(x, weight, bias, *, tile_m=None, use_bf16_matmul=False):
    """Pallas TPU implementation of LateFusionFC.forward.

    Args:
      x:      [M, 2n] input.
      weight: [n, 2n] PyTorch-layout Linear weight (NOT pre-transposed).
      bias:   [n]     Linear bias.
      tile_m: optional row-tile override.
      use_bf16_matmul: cast operands to bf16 for the MXU (f32 accumulate).
    Returns:
      [M, n] output in x's original dtype.
    """
    M, K = x.shape
    n = weight.shape[0]
    assert weight.shape == (n, K) and bias.shape == (n,)

    out_dtype = x.dtype

    # --- Lane-dense output: pad N up to a multiple of 128 --------------------
    n_pad = max(128, ((n + 127) // 128) * 128)
    if n_pad != n:
        # TODO(synk): in production, pre-pad (or fuse multiple heads into) the
        # parameter once outside the jitted call instead of per-call padding.
        weight = jnp.pad(weight, ((0, n_pad - n), (0, 0)))
        bias = jnp.pad(bias, (0, n_pad - n))
    b2d = bias.astype(jnp.float32).reshape(1, n_pad)

    # --- Optional bf16 operands: native MXU input, halves operand bytes ------
    if use_bf16_matmul:
        x = x.astype(jnp.bfloat16)
        weight = weight.astype(jnp.bfloat16)

    # --- K (reduction) tiling: last grid axis, marked "arbitrary" ------------
    if K > 2048 and K % 512 == 0:
        tile_k = 2048 if K % 2048 == 0 else 512
    else:
        tile_k = K
    grid_k = K // tile_k

    # --- Row tiling under a conservative, generation-agnostic VMEM budget ----
    # Everything auto-pipelined by BlockSpec is double-buffered; ~12 MiB keeps
    # us inside the scoped VMEM defaults on v5e (16 MiB) and v6e/v7x (32 MiB).
    x_b = x.dtype.itemsize
    w_b = weight.dtype.itemsize
    o_b = jnp.dtype(out_dtype).itemsize
    if tile_m is None:
        align = 8 if x_b >= 4 else 16
        fixed = 2 * n_pad * tile_k * w_b + 2 * n_pad * 4            # weight + bias (dbuf)
        per_row = 2 * (tile_k * x_b + n_pad * o_b) + n_pad * 4      # x + out (dbuf) + f32 acc
        budget = 12 * 1024 * 1024
        rows = max(align, (budget - fixed) // per_row)
        tile_m = min(M, 512, int(rows))
        if tile_m < M:
            tile_m = max(align, (tile_m // align) * align)
    grid_m = pl.cdiv(M, tile_m)

    cost = pl.CostEstimate(
        flops=2 * M * K * n_pad,
        transcendentals=0,
        bytes_accessed=(M * K * x_b + n_pad * K * w_b + n_pad * 4
                        + M * n_pad * o_b),
    )

    out_padded = pl.pallas_call(
        _late_fusion_fc_kernel,
        out_shape=jax.ShapeDtypeStruct((M, n_pad), out_dtype),
        grid_spec=pltpu.PrefetchScalarGridSpec(
            num_scalar_prefetch=0,
            grid=(grid_m, grid_k),
            in_specs=[
                pl.BlockSpec((tile_m, tile_k), lambda i, k: (i, k)),
                pl.BlockSpec((n_pad, tile_k), lambda i, k: (0, k)),
                pl.BlockSpec((1, n_pad), lambda i, k: (0, 0)),
            ],
            out_specs=pl.BlockSpec((tile_m, n_pad), lambda i, k: (i, 0)),
            scratch_shapes=[pltpu.VMEM((tile_m, n_pad), jnp.float32)],
        ),
        compiler_params=pltpu.CompilerParams(
            dimension_semantics=("parallel", "arbitrary"),
            vmem_limit_bytes=32 * 1024 * 1024,
        ),
        cost_estimate=cost,
    )(x, weight, b2d)

    return out_padded[:, :n] if n_pad != n else out_padded


if __name__ == "__main__":
    # Module config: n = 32 -> Linear(64, 32). Batch of 8 rows.
    n = 32
    batch = 8

    key = jax.random.PRNGKey(0)
    kx, kw, kb = jax.random.split(key, 3)

    # Deterministic synthetic parameters (PyTorch-style uniform init bound).
    bound = 1.0 / jnp.sqrt(2.0 * n)
    weight = jax.random.uniform(kw, (n, 2 * n), jnp.float32, -bound, bound)
    bias = jax.random.uniform(kb, (n,), jnp.float32, -bound, bound)
    x = jax.random.normal(kx, (batch, 2 * n), jnp.float32)

    ref = x @ weight.T + bias

    # Exact-semantics path (f32 operands, f32 accumulate).
    out = jax.block_until_ready(late_fusion_fc(x, weight, bias))
    assert out.shape == (batch, n)
    assert jnp.allclose(out, ref, atol=1e-5, rtol=1e-5)

    # Fast path: bf16 MXU operands, f32 accumulate + bias (looser tolerance).
    out_bf16 = jax.block_until_ready(
        late_fusion_fc(x, weight, bias, use_bf16_matmul=True))
    assert out_bf16.shape == (batch, n)
    assert jnp.allclose(out_bf16, ref, atol=5e-2, rtol=5e-2)

    print("KERNEL_OK")
</pallas_src>

<mosaic_0001>
module attributes {stable_mosaic.version = 11 : i64} {
  func.func @_late_fusion_fc_kernel(%arg0: i32, %arg1: i32, %arg2: memref<8x64xf32, #tpu.memory_space<vmem>>, %arg3: memref<128x64xf32, #tpu.memory_space<vmem>>, %arg4: memref<1x128xf32, #tpu.memory_space<vmem>>, %arg5: memref<8x128xf32, #tpu.memory_space<vmem>>, %arg6: memref<8x128xf32, #tpu.memory_space<vmem>>) attributes {dimension_semantics = [#tpu.dimension_semantics<parallel>, #tpu.dimension_semantics<arbitrary>], iteration_bounds = array<i64: 1, 1>, scalar_prefetch = 0 : i64, scratch_operands = 1 : i64, tpu.core_type = #tpu.core_type<tc>, window_params = [{transform_indices = @transform_0, window_bounds = array<i64: 8, 64>}, {transform_indices = @transform_1, window_bounds = array<i64: 128, 64>}, {pipeline_mode = #tpu.pipeline_mode<synchronous>, transform_indices = @transform_2, window_bounds = array<i64: 1, 128>}, {transform_indices = @transform_3, window_bounds = array<i64: 8, 128>}]} {
    %c0_i32 = arith.constant 0 : i32
    %0 = arith.cmpi eq, %arg1, %c0_i32 : i32
    %1 = arith.extui %0 : i1 to i32
    %c0_i32_0 = arith.constant 0 : i32
    %2 = arith.cmpi ne, %1, %c0_i32_0 : i32
    scf.if %2 {
      %cst_10 = arith.constant 0.000000e+00 : f32
      %12 = vector.broadcast %cst_10 : f32 to vector<8x128xf32>
      %c0_11 = arith.constant 0 : index
      %c0_12 = arith.constant 0 : index
      %13 = vector.load %arg6[%c0_11, %c0_12] : memref<8x128xf32, #tpu.memory_space<vmem>>, vector<8x128xf32>
      tpu.vector_store %arg6[%c0_11, %c0_12], %12 {strides = array<i32>} : memref<8x128xf32, #tpu.memory_space<vmem>>, vector<8x128xf32>,
    } else {
    }
    %c0 = arith.constant 0 : index
    %c0_1 = arith.constant 0 : index
    %3 = vector.load %arg6[%c0, %c0_1] : memref<8x128xf32, #tpu.memory_space<vmem>>, vector<8x128xf32>
    %c0_2 = arith.constant 0 : index
    %c0_3 = arith.constant 0 : index
    %4 = vector.load %arg2[%c0_2, %c0_3] : memref<8x64xf32, #tpu.memory_space<vmem>>, vector<8x64xf32>
    %c0_4 = arith.constant 0 : index
    %c0_5 = arith.constant 0 : index
    %5 = vector.load %arg3[%c0_4, %c0_5] : memref<128x64xf32, #tpu.memory_space<vmem>>, vector<128x64xf32>
    %cst = arith.constant dense<0.000000e+00> : vector<8x128xf32>
    %6 = tpu.matmul %4, %5, %cst {dimension_numbers = #tpu.dot_dimension_numbers<[1], [1], [0], [0], [0, 0, 1, 0], [], []>} : vector<8x64xf32>, vector<128x64xf32>, vector<8x128xf32> -> vector<8x128xf32>
    %7 = arith.addf %3, %6 : vector<8x128xf32>
    %c0_6 = arith.constant 0 : index
    %c0_7 = arith.constant 0 : index
    %8 = vector.load %arg6[%c0_6, %c0_7] : memref<8x128xf32, #tpu.memory_space<vmem>>, vector<8x128xf32>
    tpu.vector_store %arg6[%c0_6, %c0_7], %7 {strides = array<i32>} : memref<8x128xf32, #tpu.memory_space<vmem>>, vector<8x128xf32>,
    %c0_i32_8 = arith.constant 0 : i32
    %9 = arith.cmpi eq, %arg1, %c0_i32_8 : i32
    %10 = arith.extui %9 : i1 to i32
    %c0_i32_9 = arith.constant 0 : i32
    %11 = arith.cmpi ne, %10, %c0_i32_9 : i32
    scf.if %11 {
      %c0_10 = arith.constant 0 : index
      %c0_11 = arith.constant 0 : index
      %12 = vector.load %arg6[%c0_10, %c0_11] : memref<8x128xf32, #tpu.memory_space<vmem>>, vector<8x128xf32>
      %c0_12 = arith.constant 0 : index
      %c0_13 = arith.constant 0 : index
      %13 = vector.load %arg4[%c0_12, %c0_13] : memref<1x128xf32, #tpu.memory_space<vmem>>, vector<1x128xf32>
      %14 = vector.broadcast %13 : vector<1x128xf32> to vector<8x128xf32>
      %15 = arith.addf %12, %14 : vector<8x128xf32>
      %c0_14 = arith.constant 0 : index
      %c0_15 = arith.constant 0 : index
      %16 = vector.load %arg5[%c0_14, %c0_15] : memref<8x128xf32, #tpu.memory_space<vmem>>, vector<8x128xf32>
      tpu.vector_store %arg5[%c0_14, %c0_15], %15 {strides = array<i32>} : memref<8x128xf32, #tpu.memory_space<vmem>>, vector<8x128xf32>,
    } else {
    }
    return
  }
  func.func @transform_0(%arg0: i32, %arg1: i32) -> (i32, i32) {
    %c0_i32 = arith.constant 0 : i32
    return %arg0, %arg1 : i32, i32
  }
  func.func @transform_1(%arg0: i32, %arg1: i32) -> (i32, i32) {
    %c0_i32 = arith.constant 0 : i32
    %c0_i32_0 = arith.constant 0 : i32
    return %c0_i32, %arg1 : i32, i32
  }
  func.func @transform_2(%arg0: i32, %arg1: i32) -> (i32, i32) {
    %c0_i32 = arith.constant 0 : i32
    %c0_i32_0 = arith.constant 0 : i32
    %c0_i32_1 = arith.constant 0 : i32
    return %c0_i32, %c0_i32_0 : i32, i32
  }
  func.func @transform_3(%arg0: i32, %arg1: i32) -> (i32, i32) {
    %c0_i32 = arith.constant 0 : i32
    %c0_i32_0 = arith.constant 0 : i32
    return %arg0, %c0_i32 : i32, i32
  }
}

</mosaic_0001>

<bundles_post_ra>
// kernel: tpu_custom_call.1
= control target key start
LH: loop header
LB: loop body
LE: loop exit
PB: predicated region body
PF: predicated region fallthrough
CT: control target
= control target key end

     0   :  { %vm38_vm0 = vcmask 523264   ;;  %v284_v1 = vmov 0.0   ;;  %vm285_vm1 = vmmov 0   ;;  %s381_s0 = inlined_call_operand.vmem [shape: f32[8,64], index: 0, kind: input, shape index: {}]   ;;  %s382_s1 = inlined_call_operand.vmem [shape: f32[128,64], index: 1, kind: input, shape index: {}]   ;;  %s383_s2 = inlined_call_operand.vmem [shape: f32[1,128], index: 2, kind: input, shape index: {}]   ;;  %s384_s3 = inlined_call_operand.hbm [shape: f32[8,128], index: 3, kind: output, shape index: {}]  }
   0x1   :  { %v37_v0 = vld [vmem:[%s382_s1 + $0x78] sm:$0xff]  ;;  %224 = vmatprep.subr.mxu0 %v284_v1  ;;  %256 = vmatprep.mubr.msk.f32.mxu0 %vm285_vm1, %v284_v1  ;;  %v36_v2 = vld [vmem:[%s382_s1 + $0x70] sm:$0xff] }
   0x2   :  { %225 = vmatpush3.xpose.msk.msra.mxu0 %vm38_vm0, %v37_v0 }
   0x3   :  { %226 = vmatprep.subr.mxu0 %v284_v1 }
   0x4   :  { %8 = vsyncpa [#allocation4], 0  ;;  %v35_v3 = vld [vmem:[%s382_s1 + $0x68] sm:$0xff]  ;;  %v34_v4 = vld [vmem:[%s382_s1 + $0x60] sm:$0xff]  ;;  %s286_s21 = smov [#allocation3]  }
   0x5   :  { %v33_v5 = vld [vmem:[%s382_s1 + $0x58] sm:$0xff]  ;;  %v32_v6 = vld [vmem:[%s382_s1 + $0x50] sm:$0xff]  ;;  %v31_v7 = vld [vmem:[%s382_s1 + $0x48] sm:$0xff]  ;;  %s181_s22 = sshll.u32 %s286_s21, 4  ;;  %s182_s22 = int_to_ptr.vmem [resolvable:$true] %s181_s22 }
   0x6   :  { %227 = vmatpush3.xpose.msk.msra.mxu0 %vm38_vm0, %v36_v2  ;;  %v30_v8 = vld [vmem:[%s382_s1 + $0x40] sm:$0xff]  ;;  %v29_v9 = vld [vmem:[%s382_s1 + $0x38] sm:$0xff]  ;;  %v28_v10 = vld [vmem:[%s382_s1 + $0x30] sm:$0xff]  ;;  %p267_p1 = scmp.lt.s32.totalorder %s182_s22, %s182_s22 }
   0x7   :  { %228 = vmatprep.subr.mxu0 %v284_v1  ;;  %v27_v11 = vld [vmem:[%s382_s1 + $0x28] sm:$0xff]  ;;  %v26_v12 = vld [vmem:[%s382_s1 + $0x20] sm:$0xff]  ;;  %v25_v13 = vld [vmem:[%s382_s1 + $0x18] sm:$0xff] }
   0x8   :  { %v24_v14 = vld [vmem:[%s382_s1 + $0x10] sm:$0xff]  ;;  %v23_v15 = vld [vmem:[%s382_s1 + $0x8] sm:$0xff]  ;;  %v22_v16 = vld [vmem:[%s382_s1] sm:$0xff]  ;;  %s262_s1 = scalar_lea.vmem %s182_s22, 128 }
   0x9   :  { %v21_v17 = vld [vmem:[%s381_s0] sm:$0xff]  ;;  %p263_p0 = scmp.ne.s32.totalorder %s182_s22, %s262_s1  ;;  %p268_p2 = scmp.lt.s32.totalorder %s262_s1, %s262_s1 }
   0xa   :  { %229 = vmatpush3.xpose.msk.msra.mxu0 %vm38_vm0, %v35_v3  ;;  %v206_v18 = vld [vmem:[%s383_s2] ss:$0 sm:$0xff] }
   0xb   :  { %230 = vmatprep.subr.mxu0 %v284_v1  ;;  %p269_p3 = por %p268_p2, %p267_p1 }
   0xd   :  { %p270_p4 = pnand %p269_p3, %p263_p0 }
   0xe   :  { %231 = vmatpush3.xpose.msk.msra.mxu0 %vm38_vm0, %v34_v4 }
   0xf   :  { %232 = vmatprep.subr.mxu0 %v284_v1 }
  0x12   :  { %233 = vmatpush3.xpose.msk.msra.mxu0 %vm38_vm0, %v33_v5 }
  0x13   :  { %234 = vmatprep.subr.mxu0 %v284_v1 }
  0x16   :  { %235 = vmatpush3.xpose.msk.msra.mxu0 %vm38_vm0, %v32_v6 }
  0x17   :  { %236 = vmatprep.subr.mxu0 %v284_v1 }
  0x1a   :  { %237 = vmatpush3.xpose.msk.msra.mxu0 %vm38_vm0, %v31_v7 }
  0x1b   :  { %238 = vmatprep.subr.mxu0 %v284_v1 }
  0x1e   :  { %239 = vmatpush3.xpose.msk.msra.mxu0 %vm38_vm0, %v30_v8 }
  0x1f   :  { %240 = vmatprep.subr.mxu0 %v284_v1 }
  0x22   :  { %241 = vmatpush3.xpose.msk.msra.mxu0 %vm38_vm0, %v29_v9 }
  0x23   :  { %242 = vmatprep.subr.mxu0 %v284_v1 }
  0x26   :  { %243 = vmatpush3.xpose.msk.msra.mxu0 %vm38_vm0, %v28_v10 }
  0x27   :  { %244 = vmatprep.subr.mxu0 %v284_v1 }
  0x2a   :  { %245 = vmatpush3.xpose.msk.msra.mxu0 %vm38_vm0, %v27_v11 }
  0x2b   :  { %246 = vmatprep.subr.mxu0 %v284_v1 }
  0x2e   :  { %247 = vmatpush3.xpose.msk.msra.mxu0 %vm38_vm0, %v26_v12 }
  0x2f   :  { %248 = vmatprep.subr.mxu0 %v284_v1 }
  0x32   :  { %249 = vmatpush3.xpose.msk.msra.mxu0 %vm38_vm0, %v25_v13 }
  0x33   :  { %250 = vmatprep.subr.mxu0 %v284_v1 }
  0x36   :  { %251 = vmatpush3.xpose.msk.msra.mxu0 %vm38_vm0, %v24_v14 }
  0x37   :  { %252 = vmatprep.subr.mxu0 %v284_v1 }
  0x3a   :  { %253 = vmatpush3.xpose.msk.msra.mxu0 %vm38_vm0, %v23_v15 }
  0x3b   :  { %254 = vmatprep.subr.mxu0 %v284_v1 }
  0x3e   :  { %255 = vmatpush3.xpose.msk.msra.mxu0 %vm38_vm0, %v22_v16 }
  0x41   :  { %257 = vmatmul.mubr.msk.f32.vlgmr.msra.gmra.mxu0 %vm38_vm0, %v21_v17 }
 0x101   :  { %v156_v19 = vpop.f32.mrf.mxu0 }
 0x102   :  { %v173_v20 = vadd.f32 %v206_v18, %v156_v19 }
 0x103   :  { %v258_v21 = vpop.f32.mrf.mxu0 }
 0x104   :  { %174 = vst [vmem:[#allocation3] sm:$0xff] %v173_v20 }
 0x105   :  { %273 = shalt.err (!%p270_p4)
}
 0x106   :  { %184 = dma.vmem_to_hbm [thread:$0]  %s182_s22, 128, %s384_s3, [#allocation4]  }
 0x107   :  { %282 = dma.done.wait [#allocation4], 128  }
 0x108   :  { %283 = vsyncadd [#allocation4], 4294967168 }
 0x109   :  { %188 = vsyncpa [#allocation4], 1 }

</bundles_post_ra>
